<compile_context>
chip_gen: v7x
topology: tpu7x:2x2x1
jax: 0.10.0
libtpu: 0.0.40
codegen_flags: <defaults>
</compile_context>

<pallas_src>
import jax
import jax.numpy as jnp
from jax import lax
from jax.experimental import pallas as pl
from jax.experimental.pallas import tpu as pltpu


def _nll_gather_kernel(len_ref, tgt_ref, x_ref, w_ref, out_ref):
    # len_ref: (B,)      i32  SMEM (scalar prefetch; consumed by the index_map)
    # tgt_ref: (B,)      i32  SMEM (scalar prefetch)
    # x_ref:   (1, 1, C) VMEM      the single gathered time-step row x[b, t*_b, :]
    # w_ref:   (C,)      f32  SMEM NLL class weights
    # out_ref: (1, 1, 1) f32  VMEM per-sample partial loss
    del len_ref  # only used by the index_map
    b = pl.program_id(0)
    tgt = tgt_ref[b]                                   # i32 scalar
    wt = w_ref[tgt]                                    # f32 scalar (dynamic SMEM read)

    x = x_ref[0].astype(jnp.float32)                   # (1, C), cast in-kernel
    cls = lax.broadcasted_iota(jnp.int32, x.shape, 1)  # (1, C)
    picked = jnp.sum(jnp.where(cls == tgt, x, 0.0), axis=-1, keepdims=True)  # (1, 1)
    out_ref[0] = -wt * picked


def nll_sequence_loss(inp, length, target, w=(0.55, 0.45)):
    """inp: (B, T, C) float log-probs, length: (B,) int, target: (B,) int."""
    B, T, C = inp.shape
    # Contiguous reshape -> free bitcast; keeps the gather index on the leading dim so
    # the last two block dims equal the full array dims.  No dtype upcast in the wrapper.
    x = inp.reshape(B * T, 1, C)
    length_i = length.astype(jnp.int32)
    target_i = target.astype(jnp.int32)
    w_arr = jnp.asarray(w, dtype=jnp.float32)          # (C,)

    def x_index_map(b, len_ref, tgt_ref):
        del tgt_ref
        t = jnp.minimum(len_ref[b], T) - 1
        t = jnp.where(t < 0, T - 1, t)                 # length == 0 -> torch's mask[b, -1]
        return (b * T + t, 0, 0)                       # block size 1 => element index

    grid_spec = pltpu.PrefetchScalarGridSpec(
        num_scalar_prefetch=2,                         # (length, target) -> SMEM
        grid=(B,),
        in_specs=[
            pl.BlockSpec((1, 1, C), x_index_map),                      # gathered row
            pl.BlockSpec(memory_space=pltpu.MemorySpace.SMEM),         # class weights
        ],
        out_specs=pl.BlockSpec((1, 1, 1), lambda b, len_ref, tgt_ref: (b, 0, 0)),
    )

    partials = pl.pallas_call(
        _nll_gather_kernel,
        out_shape=jax.ShapeDtypeStruct((B, 1, 1), jnp.float32),
        grid_spec=grid_spec,
        compiler_params=pltpu.CompilerParams(
            dimension_semantics=("parallel",),         # distinct output blocks per step
        ),
    )(length_i, target_i, x, w_arr)

    # PyTorch divides by mask.sum(), which is exactly B (one selected step per sample).
    return jnp.sum(partials) / B


def _reference(inp, length, target, w=(0.55, 0.45)):
    # Pure-JAX mirror of the PyTorch forward (incl. negative indexing for length == 0).
    B, T, C = inp.shape
    w = jnp.asarray(w, dtype=jnp.float32)
    t_idx = jnp.minimum(length, T) - 1
    t_idx = jnp.where(t_idx < 0, T - 1, t_idx)
    gathered = inp[jnp.arange(B), t_idx, target].astype(jnp.float32)   # (B,)
    return jnp.sum(-w[target] * gathered) / B


if __name__ == "__main__":
    key = jax.random.PRNGKey(0)
    B, T, C = 4, 8, 2
    k1, k2, k3 = jax.random.split(key, 3)

    logits = jax.random.normal(k1, (B, T, C), dtype=jnp.float32)
    log_probs = jax.nn.log_softmax(logits, axis=-1)                    # NLL input
    target = jax.random.randint(k2, (B,), 0, C, dtype=jnp.int32)
    length = jax.random.randint(k3, (B,), 1, T + 1, dtype=jnp.int32)
    # Exercise edge paths: length == 0 (torch wraps to the last step) and length > T.
    length = length.at[0].set(0).at[1].set(T + 5)

    loss = jax.block_until_ready(nll_sequence_loss(log_probs, length, target))
    ref = _reference(log_probs, length, target)
    assert jnp.allclose(loss, ref, atol=1e-5, rtol=1e-5), (loss, ref)

    print("KERNEL_OK")
</pallas_src>

<mosaic_0001>
module attributes {stable_mosaic.version = 11 : i64} {
  func.func @_nll_gather_kernel(%arg0: i32, %arg1: memref<4xi32, #tpu.memory_space<smem>>, %arg2: memref<4xi32, #tpu.memory_space<smem>>, %arg3: memref<1x1x2xf32, #tpu.memory_space<vmem>>, %arg4: memref<2xf32, #tpu.memory_space<smem>>, %arg5: memref<1x1x1xf32, #tpu.memory_space<vmem>>) attributes {dimension_semantics = [#tpu.dimension_semantics<parallel>], iteration_bounds = array<i64: 4>, scalar_prefetch = 2 : i64, scratch_operands = 0 : i64, tpu.core_type = #tpu.core_type<tc>, window_params = [{transform_indices = @transform_0, window_bounds = array<i64: 1, 1, 2>}, {transform_indices = @transform_1, window_bounds = array<i64: 2>}, {transform_indices = @transform_2, window_bounds = array<i64: 1, 1, 1>}]} {
    %0 = arith.index_cast %arg0 : i32 to index
    %1 = memref.load %arg2[%0] : memref<4xi32, #tpu.memory_space<smem>>
    %2 = arith.index_cast %1 : i32 to index
    %3 = memref.load %arg4[%2] : memref<2xf32, #tpu.memory_space<smem>>
    %c0 = arith.constant 0 : index
    %c0_0 = arith.constant 0 : index
    %c0_1 = arith.constant 0 : index
    %4 = vector.load %arg3[%c0, %c0_0, %c0_1] : memref<1x1x2xf32, #tpu.memory_space<vmem>>, vector<1x1x2xf32>
    %5 = vector.shape_cast %4 : vector<1x1x2xf32> to vector<1x2xf32>
    %6 = tpu.iota {dimensions = array<i32: 1>} : vector<1x2xi32>
    %7 = vector.broadcast %1 : i32 to vector<1x2xi32>
    %8 = arith.cmpi eq, %6, %7 : vector<1x2xi32>
    %cst = arith.constant 0.000000e+00 : f32
    %9 = vector.broadcast %cst : f32 to vector<1x2xf32>
    %10 = arith.select %8, %5, %9 : vector<1x2xi1>, vector<1x2xf32>
    %cst_2 = arith.constant dense<0.000000e+00> : vector<1xf32>
    %11 = vector.multi_reduction <add>, %10, %cst_2 [1] : vector<1x2xf32> to vector<1xf32>
    %12 = vector.shape_cast %11 : vector<1xf32> to vector<1x1xf32>
    %cst_3 = arith.constant 0.000000e+00 : f32
    %13 = arith.subf %cst_3, %3 : f32
    %14 = vector.broadcast %13 : f32 to vector<1x1xf32>
    %15 = arith.mulf %14, %12 : vector<1x1xf32>
    %c0_4 = arith.constant 0 : index
    %c0_5 = arith.constant 0 : index
    %c0_6 = arith.constant 0 : index
    %16 = vector.load %arg5[%c0_4, %c0_5, %c0_6] : memref<1x1x1xf32, #tpu.memory_space<vmem>>, vector<1x1x1xf32>
    %17 = vector.shape_cast %16 : vector<1x1x1xf32> to vector<1x1xf32>
    %18 = vector.shape_cast %15 : vector<1x1xf32> to vector<1x1x1xf32>
    tpu.vector_store %arg5[%c0_4, %c0_5, %c0_6], %18 {strides = array<i32>} : memref<1x1x1xf32, #tpu.memory_space<vmem>>, vector<1x1x1xf32>,
    return
  }
  func.func @transform_0(%arg0: i32, %arg1: memref<4xi32, #tpu.memory_space<smem>>, %arg2: memref<4xi32, #tpu.memory_space<smem>>) -> (i32, i32, i32) {
    %0 = arith.index_cast %arg0 : i32 to index
    %1 = memref.load %arg1[%0] : memref<4xi32, #tpu.memory_space<smem>>
    %c8_i32 = arith.constant 8 : i32
    %2 = arith.minsi %1, %c8_i32 : i32
    %c1_i32 = arith.constant 1 : i32
    %3 = arith.subi %2, %c1_i32 : i32
    %c0_i32 = arith.constant 0 : i32
    %4 = arith.cmpi slt, %3, %c0_i32 : i32
    %c7_i32 = arith.constant 7 : i32
    %5 = arith.select %4, %c7_i32, %3 : i32
    %c8_i32_0 = arith.constant 8 : i32
    %6 = arith.muli %arg0, %c8_i32_0 : i32
    %7 = arith.addi %6, %5 : i32
    %c0_i32_1 = arith.constant 0 : i32
    %c0_i32_2 = arith.constant 0 : i32
    %c0_i32_3 = arith.constant 0 : i32
    return %7, %c0_i32_1, %c0_i32_2 : i32, i32, i32
  }
  func.func @transform_1(%arg0: i32, %arg1: memref<4xi32, #tpu.memory_space<smem>>, %arg2: memref<4xi32, #tpu.memory_space<smem>>) -> i32 {
    %c0_i32 = arith.constant 0 : i32
    %c0_i32_0 = arith.constant 0 : i32
    return %c0_i32 : i32
  }
  func.func @transform_2(%arg0: i32, %arg1: memref<4xi32, #tpu.memory_space<smem>>, %arg2: memref<4xi32, #tpu.memory_space<smem>>) -> (i32, i32, i32) {
    %c0_i32 = arith.constant 0 : i32
    %c0_i32_0 = arith.constant 0 : i32
    %c0_i32_1 = arith.constant 0 : i32
    return %arg0, %c0_i32, %c0_i32_0 : i32, i32, i32
  }
}

</mosaic_0001>

<bundles_post_ra>
// kernel: tpu_custom_call.1
= control target key start
LH: loop header
LB: loop body
LE: loop exit
PB: predicated region body
PF: predicated region fallthrough
CT: control target
= control target key end

     0   :  { %s456_s0 = inlined_call_operand.vmem [shape: s32[4], index: 0, kind: input, shape index: {}]   ;;  %s457_s2 = inlined_call_operand.vmem [shape: f32[32,1,2], index: 2, kind: input, shape index: {}]   ;;  %s458_s3 = inlined_call_operand.vmem [shape: f32[2], index: 3, kind: input, shape index: {}]   ;;  %s459_s4 = inlined_call_operand.vmem [shape: f32[4,1,1], index: 4, kind: output, shape index: {}]   ;;  %s460_s1 = inlined_call_operand.vmem [shape: s32[4], index: 1, kind: input, shape index: {}]  }
   0x1   :  { %s9_s17 = sshll.u32 %s456_s0, 4  ;;  %s13_s20 = sshll.u32 %s460_s1, 4  ;;  %s10_s17 = int_to_ptr.vmem [resolvable:$true] %s9_s17  ;;  %s14_s20 = int_to_ptr.vmem [resolvable:$true] %s13_s20 }
   0x2   :  { %s327_s21 = scalar_lea.vmem %s10_s17, 16  ;;  %p332_p1 = scmp.lt.s32.totalorder %s10_s17, %s10_s17 }
   0x3   :  { %p328_p0 = scmp.ne.s32.totalorder %s10_s17, %s327_s21  ;;  %p333_p2 = scmp.lt.s32.totalorder %s327_s21, %s327_s21 }
   0x5   :  { %p334_p3 = por %p333_p2, %p332_p1 }
   0x7   :  { %p335_p4 = pnand %p334_p3, %p328_p0 }
   0x9   :  { %338 = shalt.err (!%p335_p4)  }
   0xa   :  { %s380_s22 = smov [#allocation3]   ;;  %s339_s23 = scalar_lea.vmem %s14_s20, 16 }
   0xb   :  { %12 = dma.vmem_to_smem %s10_s17, 16, %s380_s22, [#allocation2] }
   0xc   :  { %p340_p5 = scmp.ne.s32.totalorder %s14_s20, %s339_s23  ;;  %p344_p6 = scmp.lt.s32.totalorder %s14_s20, %s14_s20 }
   0xd   :  { %p345_p7 = scmp.lt.s32.totalorder %s339_s23, %s339_s23 }
   0xf   :  { %p346_p8 = por %p345_p7, %p344_p6 }
  0x11   :  { %p347_p9 = pnand %p346_p8, %p340_p5 }
  0x13   :  { %350 = shalt.err (!%p347_p9)  }
  0x14   :  { %s381_s0 = smov [#allocation4]  }
  0x15   :  { %16 = dma.vmem_to_smem %s14_s20, 16, %s381_s0, [#allocation2] }
  0x16   :  { %370 = dma.done.wait [#allocation2], 32 }
  0x17   :  { %371 = vsyncadd [#allocation2], 4294967264 }
  0x18   :  { %18 = sfence }
  0x19   :  { %19 = vsyncpa [#allocation6], 0  ;;  %s414_s1 = smov 0  }
  0x1a LB: > { %s420_s24 = sadd.s32 4294967295, %s378_s1   ;;  %p295_p10 = scmp.ge.s32.totalorder %s378_s1, 1  ;;  %s378_s1 = sphi %s414_s1, %s25_s1  }
  0x1b   : > { %p119_p11 = scmp.lt.s32.totalorder %s378_s1, 5  ;;  %s132_s27 = sshll.u32 %s458_s3, 4  ;;  %s133_s27 = int_to_ptr.vmem [resolvable:$true] %s132_s27 }
  0x1c   : > { %p314_p13 = scmp.eq.s32.totalorder %s420_s24, 0  ;;  %s351_s29 = scalar_lea.vmem %s133_s27, 16 }
  0x1d   : > { %p427_p12 = pnand %p295_p10, %p119_p11  ;;  %p352_p2 = scmp.ne.s32.totalorder %s133_s27, %s351_s29 }
  0x1e   : > { %p359_p6 = scmp.lt.s32.totalorder %s133_s27, %s133_s27  ;;  %p360_p7 = scmp.lt.s32.totalorder %s351_s29, %s351_s29 }
  0x1f   : > { %p310_p0 = pneg %p427_p12 }
  0x20   : > { %p361_p8 = por %p360_p7, %p359_p6 }
  0x21   : > { %p311_p1 = pnand %p314_p13, %p310_p0 }
  0x23   : > { %p353_p3 = pneg %p311_p1 }
  0x25   : > { %p354_p4 = pnand %p353_p3, %p352_p2 }
  0x27   : > { %p355_p5 = pneg %p354_p4 }
  0x29   : > { %p362_p9 = pnand %p361_p8, %p355_p5 }
  0x2b   : > { %365 = shalt.err (!%p362_p9)
}
  0x2c   : > { %s382_s30 = smov [#allocation5]   ;;  %167 = sbr.rel (%p427_p12) target bundleno = 220 (0xdc), region = 28 }
  0x2d   : > { %313 = dma.vmem_to_smem (!%p311_p1), %s133_s27, 16, %s382_s30, [#allocation6]  }
  0x33   : > { %373 = dma.done.wait (%p314_p13), [#allocation6], 16  }
  0x34   : > { %375 = vsyncadd (%p314_p13), [#allocation6], 4294967280 }
  0x35   : > { %173 = sfence }
  0x36   : > { %s194_s5 = sld [smem:[#allocation3 + %s420_s24]]  ;;  %v219_v0 = vlaneseq  ;;  %s301_s8 = sshll.u32 %s420_s24, 3  ;;  %vm224_vm1 = vcmask 8192   ;;  %vm231_vm2 = vcmask 0  }
  0x37   : > { %s216_s6 = sld [smem:[#allocation4 + %s420_s24]]  ;;  %p213_p13 = scmp.lt.s32.totalorder %s420_s24, 3 }
  0x38   : > { %v220_v1 = vand.u32 127, %v219_v0 }
  0x39   : > { %s469_s24 = smov (!%p213_p13, %s420_s24), 3 }
  0x3a   : > { %s215_s17 = scalar_lea.vmem %s459_s4, %s469_s24 }
  0x3c   : > { %p195_p10 = scmp.lt.s32.totalorder %s194_s5, 8 }
  0x3d   : > { %v221_v2 = vstv %s216_s6  ;;  %s217_s13 = sld [smem:[#allocation5 + %s216_s6]] }
  0x3e   : > { %s463_s5 = smov (!%p195_p10, %s194_s5), 8  ;;  %vm222_vm0 = vcmp.eq.s32.totalorder %v220_v1, %v221_v2 }
  0x3f   : > { %s300_s7 = sadd.s32 4294967295, %s463_s5 }
  0x40   : > { %p198_p11 = scmp.lt.s32.totalorder %s300_s7, 0 }
  0x42   : > { %s465_s7 = smov (%p198_p11, %s300_s7), 7 }
  0x43   : > { %s201_s9 = sadd.s32 %s301_s8, %s465_s7  ;;  %s228_s14 = ssub.f32 0.0, %s217_s13 }
  0x44   : > { %p202_p12 = scmp.lt.s32.totalorder %s201_s9, 31 }
  0x45   : > { %v229_v6 = vstv %s228_s14 }
  0x46   : > { %s467_s9 = smov (!%p202_p12, %s201_s9), 31 }
  0x47   : > { %s204_s12 = scalar_lea.vmem %s457_s2, %s467_s9 }
  0x48   : > { %v218_v3 = vld [vmem:[%s204_s12] sm:$0x1] }
  0x49   : > { %v223_v4 = vsel %vm222_vm0, %v218_v3, 0.0 }
  0x4a   : > { %v225_v5 = vsel %vm224_vm1, %v223_v4, 0.0 }
  0x4b   : > { %226 = vadd.xlane.f32.xlu0 %v225_v5 }
  0xd8   : > { %v227_v7 = vpop.xlane.xlu0 %226 }
  0xd9   : > { %v230_v8 = vmul.f32 %v229_v6, %v227_v7 }
  0xdb   : > { %232 = vst.msk [vmem:[%s215_s17] sm:$0x1] %vm231_vm2, %v230_v8 }
  0xdc PF: > { %s25_s1 = sadd.s32 1, %s378_s1  }
  0xdd   : > { %p22_p0 = scmp.ge.s32.totalorder %s25_s1, 6  }
  0xdf   :  { %24 = sbr.rel (!%p22_p0) target bundleno = 26 (0x1a), region = 63 }
  0xe6   :  { %250 = vsyncpa [#allocation6], 1 }
  0xe7   :  { %252 = vsyncpa [#allocation6 + $0x1], 1 }

</bundles_post_ra>
